<compile_context>
chip_gen: v6e
topology: v6e:2x2x1
jax: 0.10.0
libtpu: 0.0.40
codegen_flags: <defaults>
</compile_context>

<pallas_src>
import functools

import jax
import jax.numpy as jnp
from jax import lax
from jax.experimental import pallas as pl
from jax.experimental.pallas import tpu as pltpu

EPS = 1e-12  # matches torch.nn.functional.normalize default

_VMEM_TILE_BUDGET = 32 * 1024 * 1024   # double-buffered tile budget
_VMEM_LIMIT_BYTES = 48 * 1024 * 1024   # explicit scoped-VMEM request (safe on v5e/v6e/v7x)


def _round_up(x, m):
    return (x + m - 1) // m * m


def _sublane_granule(dtype):
    # Packed sublane granule: 8 for 4-byte, 16 for 2-byte, 32 for 1-byte dtypes.
    itemsize = jnp.dtype(dtype).itemsize
    return 8 * max(1, 4 // itemsize)


def _fit_tiles(tm, tn, d_pad, itemsize, sub, budget):
    """Shrink (tm, tn) until the double-buffered VMEM footprint fits the budget.

    Prefer shrinking tm (it only affects per-step overhead; the weight tile is
    held across the batch axis and streamed-feature intensity depends on tn).
    """
    def footprint(tm_, tn_):
        return (2 * (tm_ + tn_) * d_pad * itemsize    # double-buffered x / w tiles
                + 2 * tm_ * tn_ * 4                   # double-buffered f32 output tile
                + 2 * (tm_ + tn_) * 4)                # 1/||x||, 1/||w|| side tiles

    while footprint(tm, tn) > budget:
        if tm > sub:
            tm = max(sub, _round_up(tm // 2, sub))
        elif tn > 128:
            tn = max(128, tn // 2)
        else:
            break
    return tm, tn


def _arc_margin_kernel(x_ref, w_ref, inv_x_ref, inv_w_ref, o_ref):
    # x_ref:     (TM, D)  feature tile (streamed), input dtype
    # w_ref:     (TN, D)  weight tile (held across the inner batch axis), input dtype
    # inv_x_ref: (TM, 1)  precomputed 1 / max(||x_row||, EPS), f32
    # inv_w_ref: (1, TN)  precomputed 1 / max(||w_row||, EPS), f32
    # o_ref:     (TM, TN) cosine output tile, f32
    acc = lax.dot_general(
        x_ref[...],
        w_ref[...],
        dimension_numbers=(((1,), (1,)), ((), ())),   # contract shared last dim
        preferred_element_type=jnp.float32,
    )  # (TM, TN) f32 on the MXU
    # Post-matmul normalization: rows by 1/||x||, columns by 1/||w||.
    o_ref[...] = (acc * inv_x_ref[...] * inv_w_ref[...]).astype(o_ref.dtype)


@functools.partial(jax.jit, static_argnames=("tm", "tn"))
def arc_margin_product(features, weight, *, tm=512, tn=512):
    """cosine = normalize(features) @ normalize(weight).T via a tiled Pallas kernel."""
    B, D = features.shape
    C, D2 = weight.shape
    assert D == D2, "in_features mismatch"

    itemsize = jnp.dtype(features.dtype).itemsize
    sub = _sublane_granule(features.dtype)

    # --- tile sizes -----------------------------------------------------------
    d_pad = _round_up(D, 128)

    # Class axis: pad only to the 128 granule, then pick the largest tn dividing it.
    c_pad = _round_up(C, 128)
    tn_max = min(tn, 512)
    tn = 128
    for cand in (512, 256, 128):
        if cand <= tn_max and c_pad % cand == 0:
            tn = cand
            break

    # Batch axis: round to the dtype sublane-packing granule.
    b_pad_min = _round_up(B, sub)
    tm = min(tm, b_pad_min)

    # Keep the double-buffered footprint within budget (matters for large D).
    tm, tn = _fit_tiles(tm, tn, d_pad, itemsize, sub, _VMEM_TILE_BUDGET)

    b_pad = _round_up(B, tm)
    c_pad = _round_up(C, tn)   # unchanged unless tn shrank; still <=127 extra when tn=128

    # --- norm reciprocals (computed once, on the UNpadded arrays) -------------
    xf = features.astype(jnp.float32)
    inv_x = lax.rsqrt(jnp.maximum(jnp.sum(xf * xf, axis=1, keepdims=True), EPS * EPS))  # (B,1)
    wf = weight.astype(jnp.float32)
    inv_w = lax.rsqrt(jnp.maximum(jnp.sum(wf * wf, axis=1, keepdims=True), EPS * EPS))  # (C,1)
    inv_w = inv_w.reshape(1, C)

    # --- zero padding to tile multiples ----------------------------------------
    x = features
    w = weight
    if (b_pad, d_pad) != (B, D):
        x = jnp.pad(x, ((0, b_pad - B), (0, d_pad - D)))
    if (c_pad, d_pad) != (C, D):
        w = jnp.pad(w, ((0, c_pad - C), (0, d_pad - D)))
    if b_pad != B:
        inv_x = jnp.pad(inv_x, ((0, b_pad - B), (0, 0)))   # padded rows -> 0 (sliced off)
    if c_pad != C:
        inv_w = jnp.pad(inv_w, ((0, 0), (0, c_pad - C)))   # padded cols -> 0 (sliced off)

    # --- pallas call ------------------------------------------------------------
    # Grid: class tiles OUTER (weight tile held / DMA'd once), batch tiles INNER.
    grid = (c_pad // tn, b_pad // tm)

    out = pl.pallas_call(
        _arc_margin_kernel,
        out_shape=jax.ShapeDtypeStruct((b_pad, c_pad), jnp.float32),
        grid_spec=pltpu.PrefetchScalarGridSpec(
            num_scalar_prefetch=0,
            grid=grid,
            in_specs=[
                pl.BlockSpec((tm, d_pad), lambda j, i: (i, 0)),   # features (streamed)
                pl.BlockSpec((tn, d_pad), lambda j, i: (j, 0)),   # weight (held across i)
                pl.BlockSpec((tm, 1), lambda j, i: (i, 0)),       # 1/||x||
                pl.BlockSpec((1, tn), lambda j, i: (0, j)),       # 1/||w||
            ],
            out_specs=pl.BlockSpec((tm, tn), lambda j, i: (i, j)),
        ),
        compiler_params=pltpu.CompilerParams(
            dimension_semantics=("parallel", "parallel"),
            vmem_limit_bytes=_VMEM_LIMIT_BYTES,
        ),
    )(x, w, inv_x, inv_w)

    # TODO(synk): for very large in_features (D >= ~8k) a K-tiled grid axis with an
    # f32 VMEM accumulator would decouple tile footprint from D; the footprint clamp
    # above is sufficient for typical ArcFace embedding sizes.
    return out[:B, :C]


def xavier_uniform(key, out_features, in_features, dtype=jnp.float32):
    # nn.init.xavier_uniform_: U(-a, a), a = sqrt(6 / (fan_in + fan_out))
    bound = (6.0 / (in_features + out_features)) ** 0.5
    return jax.random.uniform(
        key, (out_features, in_features), dtype=dtype, minval=-bound, maxval=bound
    )


if __name__ == "__main__":
    in_features = 32
    out_features = 16
    batch = 8

    key = jax.random.PRNGKey(0)
    k_feat, k_w = jax.random.split(key)

    features = jax.random.normal(k_feat, (batch, in_features), dtype=jnp.float32)
    weight = xavier_uniform(k_w, out_features, in_features)

    cosine = arc_margin_product(features, weight)
    cosine = jax.block_until_ready(cosine)

    # Reference check in plain JAX (same math as torch: eps-clamped L2 normalize).
    fn = features / jnp.maximum(jnp.linalg.norm(features, axis=1, keepdims=True), EPS)
    wn = weight / jnp.maximum(jnp.linalg.norm(weight, axis=1, keepdims=True), EPS)
    ref = fn @ wn.T
    assert cosine.shape == ref.shape, "shape mismatch vs reference"
    assert jnp.allclose(cosine, ref, atol=1e-5, rtol=1e-5), "mismatch vs reference"

    print("KERNEL_OK")
</pallas_src>

<mosaic_0001>
module attributes {stable_mosaic.version = 11 : i64} {
  func.func @_arc_margin_kernel(%arg0: i32, %arg1: i32, %arg2: memref<8x128xf32, #tpu.memory_space<vmem>>, %arg3: memref<128x128xf32, #tpu.memory_space<vmem>>, %arg4: memref<8x1xf32, #tpu.memory_space<vmem>>, %arg5: memref<1x128xf32, #tpu.memory_space<vmem>>, %arg6: memref<8x128xf32, #tpu.memory_space<vmem>>) attributes {dimension_semantics = [#tpu.dimension_semantics<parallel>, #tpu.dimension_semantics<parallel>], iteration_bounds = array<i64: 1, 1>, scalar_prefetch = 0 : i64, scratch_operands = 0 : i64, tpu.core_type = #tpu.core_type<tc>, window_params = [{transform_indices = @transform_0, window_bounds = array<i64: 8, 128>}, {transform_indices = @transform_1, window_bounds = array<i64: 128, 128>}, {transform_indices = @transform_2, window_bounds = array<i64: 8, 1>}, {transform_indices = @transform_3, window_bounds = array<i64: 1, 128>}, {transform_indices = @transform_4, window_bounds = array<i64: 8, 128>}]} {
    %c0 = arith.constant 0 : index
    %c0_0 = arith.constant 0 : index
    %0 = vector.load %arg2[%c0, %c0_0] : memref<8x128xf32, #tpu.memory_space<vmem>>, vector<8x128xf32>
    %c0_1 = arith.constant 0 : index
    %c0_2 = arith.constant 0 : index
    %1 = vector.load %arg3[%c0_1, %c0_2] : memref<128x128xf32, #tpu.memory_space<vmem>>, vector<128x128xf32>
    %cst = arith.constant dense<0.000000e+00> : vector<8x128xf32>
    %2 = tpu.matmul %0, %1, %cst {dimension_numbers = #tpu.dot_dimension_numbers<[1], [1], [0], [0], [0, 0, 1, 0], [], []>} : vector<8x128xf32>, vector<128x128xf32>, vector<8x128xf32> -> vector<8x128xf32>
    %c0_3 = arith.constant 0 : index
    %c0_4 = arith.constant 0 : index
    %3 = vector.load %arg4[%c0_3, %c0_4] : memref<8x1xf32, #tpu.memory_space<vmem>>, vector<8x1xf32>
    %4 = vector.broadcast %3 : vector<8x1xf32> to vector<8x128xf32>
    %5 = arith.mulf %2, %4 : vector<8x128xf32>
    %c0_5 = arith.constant 0 : index
    %c0_6 = arith.constant 0 : index
    %6 = vector.load %arg5[%c0_5, %c0_6] : memref<1x128xf32, #tpu.memory_space<vmem>>, vector<1x128xf32>
    %7 = vector.broadcast %6 : vector<1x128xf32> to vector<8x128xf32>
    %8 = arith.mulf %5, %7 : vector<8x128xf32>
    %c0_7 = arith.constant 0 : index
    %c0_8 = arith.constant 0 : index
    %9 = vector.load %arg6[%c0_7, %c0_8] : memref<8x128xf32, #tpu.memory_space<vmem>>, vector<8x128xf32>
    tpu.vector_store %arg6[%c0_7, %c0_8], %8 {strides = array<i32>} : memref<8x128xf32, #tpu.memory_space<vmem>>, vector<8x128xf32>,
    return
  }
  func.func @transform_0(%arg0: i32, %arg1: i32) -> (i32, i32) {
    %c0_i32 = arith.constant 0 : i32
    %c0_i32_0 = arith.constant 0 : i32
    return %arg1, %c0_i32 : i32, i32
  }
  func.func @transform_1(%arg0: i32, %arg1: i32) -> (i32, i32) {
    %c0_i32 = arith.constant 0 : i32
    %c0_i32_0 = arith.constant 0 : i32
    return %arg0, %c0_i32 : i32, i32
  }
  func.func @transform_2(%arg0: i32, %arg1: i32) -> (i32, i32) {
    %c0_i32 = arith.constant 0 : i32
    %c0_i32_0 = arith.constant 0 : i32
    return %arg1, %c0_i32 : i32, i32
  }
  func.func @transform_3(%arg0: i32, %arg1: i32) -> (i32, i32) {
    %c0_i32 = arith.constant 0 : i32
    %c0_i32_0 = arith.constant 0 : i32
    return %c0_i32, %arg0 : i32, i32
  }
  func.func @transform_4(%arg0: i32, %arg1: i32) -> (i32, i32) {
    %c0_i32 = arith.constant 0 : i32
    return %arg1, %arg0 : i32, i32
  }
}

</mosaic_0001>

<bundles_post_ra>
// kernel: arc_margin_product.1
= control target key start
LH: loop header
LB: loop body
LE: loop exit
PB: predicated region body
PF: predicated region fallthrough
CT: control target
= control target key end

     0   :  { %v215_v1 = vmov 0.0   ;;  %vm216_vm0 = vmmov 0   ;;  %v217_v2 = vmov 0   ;;  %s304_s0 = inlined_call_operand.vmem [shape: f32[8,128], index: 0, kind: input, shape index: {}]   ;;  %s305_s1 = inlined_call_operand.vmem [shape: f32[128,128], index: 1, kind: input, shape index: {}]   ;;  %s306_s2 = inlined_call_operand.vmem [shape: f32[8,1], index: 2, kind: input, shape index: {}]   ;;  %s307_s3 = inlined_call_operand.vmem [shape: f32[1,128], index: 3, kind: input, shape index: {}]   ;;  %s308_s4 = inlined_call_operand.hbm [shape: f32[8,128], index: 4, kind: output, shape index: {}]  }
   0x1   :  { %v34_v0 = vld [vmem:[%s305_s1 + $0x78] sm:$0xff]  ;;  %153 = vmatprep.subr.mxu0 %v215_v1  ;;  %185 = vmatprep.mubr.msk.f32.mxu0 %vm216_vm0, %v215_v1  ;;  %v33_v3 = vld [vmem:[%s305_s1 + $0x70] sm:$0xff]  ;;  %v105_v4 = vld [vmem:[%s306_s2] sm:$0xff] }
   0x2   :  { %154 = vmatpush3.xpose.msra.mxu0 %v34_v0  ;;  %192 = vset.pattern.permute.xlu0 %v217_v2 }
   0x3   :  { %155 = vmatprep.subr.mxu0 %v215_v1  ;;  %108 = vperm.xlu0 %192, %v105_v4  }
   0x6   :  { %156 = vmatpush3.xpose.msra.mxu0 %v33_v3 }
   0x7   :  { %9 = vsyncpa [#allocation3], 0  ;;  %157 = vmatprep.subr.mxu0 %v215_v1  ;;  %v32_v5 = vld [vmem:[%s305_s1 + $0x68] sm:$0xff]  ;;  %v31_v6 = vld [vmem:[%s305_s1 + $0x60] sm:$0xff]  ;;  %s218_s26 = smov [#allocation2]  }
   0x8   :  { %v30_v7 = vld [vmem:[%s305_s1 + $0x58] sm:$0xff]  ;;  %v29_v8 = vld [vmem:[%s305_s1 + $0x50] sm:$0xff]  ;;  %v28_v9 = vld [vmem:[%s305_s1 + $0x48] sm:$0xff]  ;;  %s127_s2 = sshll.u32 %s218_s26, 4  ;;  %s128_s2 = int_to_ptr.vmem [resolvable:$true] %s127_s2 }
   0x9   :  { %v27_v10 = vld [vmem:[%s305_s1 + $0x40] sm:$0xff]  ;;  %v26_v11 = vld [vmem:[%s305_s1 + $0x38] sm:$0xff]  ;;  %v25_v12 = vld [vmem:[%s305_s1 + $0x30] sm:$0xff]  ;;  %p198_p1 = scmp.lt.s32.totalorder %s128_s2, %s128_s2 }
   0xa   :  { %158 = vmatpush3.xpose.msra.mxu0 %v32_v5  ;;  %v24_v13 = vld [vmem:[%s305_s1 + $0x28] sm:$0xff]  ;;  %v23_v14 = vld [vmem:[%s305_s1 + $0x20] sm:$0xff]  ;;  %v22_v15 = vld [vmem:[%s305_s1 + $0x18] sm:$0xff] }
   0xb   :  { %159 = vmatprep.subr.mxu0 %v215_v1  ;;  %v21_v16 = vld [vmem:[%s305_s1 + $0x10] sm:$0xff]  ;;  %v20_v17 = vld [vmem:[%s305_s1 + $0x8] sm:$0xff]  ;;  %v19_v18 = vld [vmem:[%s305_s1] sm:$0xff]  ;;  %s193_s1 = scalar_lea.vmem %s128_s2, 128 }
   0xc   :  { %v18_v19 = vld [vmem:[%s304_s0] sm:$0xff]  ;;  %p194_p0 = scmp.ne.s32.totalorder %s128_s2, %s193_s1  ;;  %p199_p2 = scmp.lt.s32.totalorder %s193_s1, %s193_s1 }
   0xd   :  { %v135_v22 = vld [vmem:[%s307_s3] ss:$0 sm:$0xff] }
   0xe   :  { %160 = vmatpush3.xpose.msra.mxu0 %v31_v6  ;;  %p200_p3 = por %p199_p2, %p198_p1 }
   0xf   :  { %161 = vmatprep.subr.mxu0 %v215_v1 }
  0x10   :  { %p201_p4 = pnand %p200_p3, %p194_p0 }
  0x12   :  { %162 = vmatpush3.xpose.msra.mxu0 %v30_v7 }
  0x13   :  { %163 = vmatprep.subr.mxu0 %v215_v1 }
  0x16   :  { %164 = vmatpush3.xpose.msra.mxu0 %v29_v8 }
  0x17   :  { %165 = vmatprep.subr.mxu0 %v215_v1 }
  0x1a   :  { %166 = vmatpush3.xpose.msra.mxu0 %v28_v9 }
  0x1b   :  { %167 = vmatprep.subr.mxu0 %v215_v1 }
  0x1e   :  { %168 = vmatpush3.xpose.msra.mxu0 %v27_v10 }
  0x1f   :  { %169 = vmatprep.subr.mxu0 %v215_v1 }
  0x22   :  { %170 = vmatpush3.xpose.msra.mxu0 %v26_v11 }
  0x23   :  { %171 = vmatprep.subr.mxu0 %v215_v1 }
  0x26   :  { %172 = vmatpush3.xpose.msra.mxu0 %v25_v12 }
  0x27   :  { %173 = vmatprep.subr.mxu0 %v215_v1 }
  0x2a   :  { %174 = vmatpush3.xpose.msra.mxu0 %v24_v13 }
  0x2b   :  { %175 = vmatprep.subr.mxu0 %v215_v1 }
  0x2e   :  { %176 = vmatpush3.xpose.msra.mxu0 %v23_v14 }
  0x2f   :  { %177 = vmatprep.subr.mxu0 %v215_v1 }
  0x32   :  { %178 = vmatpush3.xpose.msra.mxu0 %v22_v15 }
  0x33   :  { %179 = vmatprep.subr.mxu0 %v215_v1 }
  0x36   :  { %180 = vmatpush3.xpose.msra.mxu0 %v21_v16 }
  0x37   :  { %181 = vmatprep.subr.mxu0 %v215_v1 }
  0x3a   :  { %182 = vmatpush3.xpose.msra.mxu0 %v20_v17 }
  0x3b   :  { %183 = vmatprep.subr.mxu0 %v215_v1 }
  0x3e   :  { %184 = vmatpush3.xpose.msra.mxu0 %v19_v18 }
  0x41   :  { %186 = vmatmul.mubr.f32.vlgmr.msra.gmra.mxu0 %v18_v19 }
  0x7e   :  { %v109_v20 = vpop.permute.xlu0 %108 }
 0x101   :  { %v101_v21 = vpop.f32.mrf.mxu0 }
 0x102   :  { %v111_v23 = vmul.f32 %v109_v20, %v101_v21 }
 0x103   :  { %v187_v24 = vpop.f32.mrf.mxu0 }
 0x104   :  { %v119_v25 = vmul.f32 %v135_v22, %v111_v23 }
 0x106   :  { %120 = vst [vmem:[#allocation2] sm:$0xff] %v119_v25 }
 0x107   :  { %204 = shalt.err (!%p201_p4)
}
 0x108   :  { %130 = dma.vmem_to_hbm [thread:$0]  %s128_s2, 128, %s308_s4, [#allocation3]  }
 0x109   :  { %213 = dma.done.wait [#allocation3], 128  }
 0x10a   :  { %214 = vsyncadd [#allocation3], 4294967168 }
 0x10b   :  { %134 = vsyncpa [#allocation3], 1 }

</bundles_post_ra>
